<compile_context>
chip_gen: v7x
topology: tpu7x:2x2x1
jax: 0.10.0
libtpu: 0.0.40
codegen_flags: <defaults>
</compile_context>

<pallas_src>
import jax
import jax.numpy as jnp
from jax.experimental import pallas as pl
from jax.experimental.pallas import tpu as pltpu


def _round_up(x, m):
    return ((x + m - 1) // m) * m


# --------------------------------------------------------------------------------------
# Pallas kernel: one row-tile of nodes per grid step; weights resident in VMEM.
# --------------------------------------------------------------------------------------
def _tgcn_attack_kernel(a_ref, t_ref, y_ref,
                        wz_ref, wh_ref, bz_ref, bh_ref,
                        wlab1_ref, blab1_ref, wlab2_ref, blab2_ref,
                        whd_ref, wyd_ref, bd_ref,
                        out_ref):
    # ---- graph propagation for both gates at once:  p = Â_tile @ (X [Θz|Θh]) ----
    # a_ref / t_ref are bf16; accumulation is f32 on the MXU.
    p = jnp.dot(a_ref[...], t_ref[...], preferred_element_type=jnp.float32)   # (TM, 2H)

    # ---- TGCN cell with zero initial hidden state (r-gate dropped, exact) ----
    # Two lane-aligned gate matmuls (each weight is zero on the half of p it ignores),
    # avoiding lane-32 slices of p.
    z = jax.nn.sigmoid(
        jnp.dot(p, wz_ref[...], preferred_element_type=jnp.float32) + bz_ref[...])
    h_tilde = jnp.tanh(
        jnp.dot(p, wh_ref[...], preferred_element_type=jnp.float32) + bh_ref[...])
    h = (1.0 - z) * h_tilde                       # Z*H0 + (1-Z)*H̃  with  H0 == 0

    # ---- labels branch: ReLU(Linear(C,32)(y)) -> ReLU(Linear(32,C)(·)) ----
    y = y_ref[...]
    y1 = jnp.maximum(
        jnp.dot(y, wlab1_ref[...], preferred_element_type=jnp.float32) + blab1_ref[...], 0.0)
    y2 = jnp.maximum(
        jnp.dot(y1, wlab2_ref[...], preferred_element_type=jnp.float32) + blab2_ref[...], 0.0)

    # ---- combine + 2-class softmax ----
    # self.linear is folded into the combine weight on the host (no nonlinearity between
    # them); softmax over two classes is exactly  p0 = sigmoid(l0 - l1),  p1 = 1 - p0,
    # using pre-folded logit-difference columns (whd / wyd / bd).
    d = (jnp.dot(jnp.maximum(h, 0.0), whd_ref[...], preferred_element_type=jnp.float32)
         + jnp.dot(y2, wyd_ref[...], preferred_element_type=jnp.float32)
         + bd_ref[...])                           # (TM, 1)
    p0 = jax.nn.sigmoid(d)
    out_ref[...] = jnp.concatenate([p0, 1.0 - p0], axis=-1).astype(out_ref.dtype)


# --------------------------------------------------------------------------------------
# Host-side glue
# --------------------------------------------------------------------------------------
def build_gcn_adj(edge_index, edge_weight, num_nodes):
    """Dense normalized adjacency, exactly PyG gcn_norm: D^-1/2 (A + I) D^-1/2."""
    src, dst = edge_index[0], edge_index[1]
    loop = jnp.arange(num_nodes, dtype=src.dtype)
    src = jnp.concatenate([src, loop])
    dst = jnp.concatenate([dst, loop])
    w = jnp.concatenate([edge_weight.astype(jnp.float32),
                         jnp.ones((num_nodes,), jnp.float32)])
    deg = jnp.zeros((num_nodes,), jnp.float32).at[dst].add(w)
    dinv = jnp.where(deg > 0.0, jax.lax.rsqrt(deg), 0.0)
    norm = dinv[src] * w * dinv[dst]
    return jnp.zeros((num_nodes, num_nodes), jnp.float32).at[dst, src].add(norm)


def tgcn_attack_forward(x, y, edge_index, edge_weight, packed, H=None, tile_m=512):
    """Returns (softmax probabilities (N, 2), H) — mirroring TGCN_Attack.forward."""
    # TODO(synk): only the H=None path is implemented; the kernel specializes to a zero
    # initial hidden state (the r-gate and every H-side matmul are then exactly zero).
    assert H is None
    N = x.shape[0]
    C = y.shape[1]
    Hd = packed["w_gate_z"].shape[1]
    hi = jax.lax.Precision.HIGHEST

    # Normalized adjacency (data-dependent scatter — built once in plain JAX) and the
    # staged propagation operand t = X @ [Θz|Θh] (computed once, not per row tile).
    A = build_gcn_adj(edge_index, edge_weight, N)
    t = jnp.dot(x.astype(jnp.float32), packed["w_gcn"], precision=hi)        # (N, 2H)

    # ---- row tiling of the node dimension (zero padding is exact) ----
    TILE_M = min(int(tile_m), _round_up(N, 8))
    Np = _round_up(N, TILE_M)
    # Keep the multi-buffered Â stream inside a conservative VMEM budget (v7x: 64 MiB phys).
    # TODO(synk): add a K-axis (column-block) grid dim + f32 accumulator scratch once even an
    # 8-row Â slab no longer fits (very large graphs), and block-sparse propagation via
    # PrefetchScalarGridSpec occupancy tables for real (sparse) graphs.
    while TILE_M > 8 and 3 * TILE_M * Np * 2 > 24 * 1024 * 1024:
        TILE_M //= 2
    n_tiles = Np // TILE_M

    # HBM-dominant operands in bf16 (f32 accumulation happens on the MXU).
    # TODO(synk): int8 Â (v5e/v6e) or fp8 Â (v7x) with per-row scales for another ~2x.
    A = jnp.pad(A, ((0, Np - N), (0, Np - N))).astype(jnp.bfloat16)
    t = jnp.pad(t, ((0, Np - N), (0, 0))).astype(jnp.bfloat16)
    yp = jnp.pad(y.astype(jnp.float32), ((0, Np - N), (0, 0)))

    row = lambda i: (i, 0)     # row-tiled operands
    full = lambda i: (0, 0)    # constant-index blocks: fetched once, kept resident

    if n_tiles >= 3:           # deepen pipelining on the dominant (Â) stream
        a_spec = pl.BlockSpec((TILE_M, Np), row, pipeline_mode=pl.Buffered(3))
    else:
        a_spec = pl.BlockSpec((TILE_M, Np), row)

    in_specs = [
        a_spec,                                   # Â row tile            (TM, Np)  bf16
        pl.BlockSpec((Np, 2 * Hd), full),         # t = X [Θz|Θh]         (Np, 2H)  bf16
        pl.BlockSpec((TILE_M, C), row),           # y row tile            (TM, C)
        pl.BlockSpec((2 * Hd, Hd), full),         # gate z weight (lower half zero)
        pl.BlockSpec((2 * Hd, Hd), full),         # gate h weight (upper half zero)
        pl.BlockSpec((1, Hd), full),              # gate z bias (GCN bias folded through)
        pl.BlockSpec((1, Hd), full),              # gate h bias
        pl.BlockSpec((C, Hd), full),              # labels[0] weight
        pl.BlockSpec((1, Hd), full),              # labels[0] bias
        pl.BlockSpec((Hd, C), full),              # labels[2] weight
        pl.BlockSpec((1, C), full),               # labels[2] bias
        pl.BlockSpec((Hd, 1), full),              # folded  relu(h) -> (l0 - l1)
        pl.BlockSpec((C, 1), full),               # folded  y2      -> (l0 - l1)
        pl.BlockSpec((1, 1), full),               # folded bias difference
    ]

    probs = pl.pallas_call(
        _tgcn_attack_kernel,
        out_shape=jax.ShapeDtypeStruct((Np, 2), jnp.float32),
        grid=(n_tiles,),
        in_specs=in_specs,
        out_specs=pl.BlockSpec((TILE_M, 2), row),
        compiler_params=pltpu.CompilerParams(
            dimension_semantics=("parallel",),          # shards row tiles across v7x's 2 TCs
            vmem_limit_bytes=48 * 1024 * 1024),
    )(A, t, yp,
      packed["w_gate_z"], packed["w_gate_h"], packed["b_gate_z"], packed["b_gate_h"],
      packed["w_lab1"], packed["b_lab1"], packed["w_lab2"], packed["b_lab2"],
      packed["w_hd"], packed["w_yd"], packed["b_d"])
    return probs[:N], H


# --------------------------------------------------------------------------------------
# Parameters (torch-shaped) and packing into the kernel's fused slabs (exact rewrites)
# --------------------------------------------------------------------------------------
def init_params(key, node_features, num_classes, hidden=32):
    Fd, Hd, C = node_features, hidden, num_classes
    ks = jax.random.split(key, 18)

    def glorot(k, shape):
        lim = (6.0 / (shape[0] + shape[1])) ** 0.5
        return jax.random.uniform(k, shape, jnp.float32, -lim, lim)

    def linear(kw, kb, in_f, out_f):   # torch.nn.Linear(in,out): weight (out,in), bias (out,)
        lim = 1.0 / (in_f ** 0.5)
        return (jax.random.uniform(kw, (out_f, in_f), jnp.float32, -lim, lim),
                jax.random.uniform(kb, (out_f,), jnp.float32, -lim, lim))

    p = {
        # TGCN: GCNConv(F, H) per gate (weight used as X @ Θ; bias init zeros as in PyG)
        "theta_z": glorot(ks[0], (Fd, Hd)), "gcn_bias_z": jnp.zeros((Hd,), jnp.float32),
        "theta_r": glorot(ks[1], (Fd, Hd)), "gcn_bias_r": jnp.zeros((Hd,), jnp.float32),
        "theta_h": glorot(ks[2], (Fd, Hd)), "gcn_bias_h": jnp.zeros((Hd,), jnp.float32),
    }
    p["lin_z_w"], p["lin_z_b"] = linear(ks[3], ks[4], 2 * Hd, Hd)     # TGCN.linear_z
    p["lin_r_w"], p["lin_r_b"] = linear(ks[5], ks[6], 2 * Hd, Hd)     # TGCN.linear_r (dead)
    p["lin_h_w"], p["lin_h_b"] = linear(ks[7], ks[8], 2 * Hd, Hd)     # TGCN.linear_h
    p["lin_w"],   p["lin_b"]   = linear(ks[9], ks[10], Hd, C)         # self.linear
    p["lab1_w"],  p["lab1_b"]  = linear(ks[11], ks[12], C, Hd)        # labels[0]
    p["lab2_w"],  p["lab2_b"]  = linear(ks[13], ks[14], Hd, C)        # labels[2]
    p["comb_w"],  p["comb_b"]  = linear(ks[15], ks[16], 2 * C, 2)     # combine[0]
    return p


def pack_params(p, hidden=32):
    Hd = hidden
    C = p["lin_w"].shape[0]
    # staged graph-propagation weight  [Θz | Θh]  (the r gate is dead when H0 == 0)
    w_gcn = jnp.concatenate([p["theta_z"], p["theta_h"]], axis=1)                 # (F, 2H)
    # gate linears: only the X-halves survive (the H-halves multiply H0 == 0); keep z / h̃
    # lane-aligned by zero-padding into (2H, H) operands applied to p = Â X [Θz|Θh]
    Wz = p["lin_z_w"][:, :Hd].T                                                   # (H, H)
    Wh = p["lin_h_w"][:, :Hd].T
    w_gate_z = jnp.zeros((2 * Hd, Hd), jnp.float32).at[:Hd, :].set(Wz)
    w_gate_h = jnp.zeros((2 * Hd, Hd), jnp.float32).at[Hd:, :].set(Wh)
    # fold the GCNConv biases through the gate linears:  (ÂXΘ + b) W = (ÂXΘ) W + b W   (exact)
    b_gate_z = p["gcn_bias_z"].reshape(1, Hd) @ Wz + p["lin_z_b"].reshape(1, Hd)
    b_gate_h = p["gcn_bias_h"].reshape(1, Hd) @ Wh + p["lin_h_b"].reshape(1, Hd)
    # labels branch
    w_lab1 = p["lab1_w"].T                       # (C, H)
    b_lab1 = p["lab1_b"].reshape(1, Hd)
    w_lab2 = p["lab2_w"].T                       # (H, C)
    b_lab2 = p["lab2_b"].reshape(1, C)
    # combine: fold self.linear into the h-half of the combine weight (no nonlinearity in
    # between) and reduce the 2-class softmax to a single logit-difference column d = l0 - l1
    Wc_h = p["comb_w"][:, :C].T                                                   # (C, 2)
    Wc_y = p["comb_w"][:, C:].T                                                   # (C, 2)
    W_h2 = p["lin_w"].T @ Wc_h                                                    # (H, 2)
    b2 = p["lin_b"].reshape(1, C) @ Wc_h + p["comb_b"].reshape(1, 2)              # (1, 2)
    w_hd = (W_h2[:, 0] - W_h2[:, 1]).reshape(Hd, 1)
    w_yd = (Wc_y[:, 0] - Wc_y[:, 1]).reshape(C, 1)
    b_d = (b2[:, 0] - b2[:, 1]).reshape(1, 1)
    return dict(w_gcn=w_gcn,
                w_gate_z=w_gate_z, w_gate_h=w_gate_h,
                b_gate_z=b_gate_z, b_gate_h=b_gate_h,
                w_lab1=w_lab1, b_lab1=b_lab1, w_lab2=w_lab2, b_lab2=b_lab2,
                w_hd=w_hd, w_yd=w_yd, b_d=b_d)


# --------------------------------------------------------------------------------------
# Pure-JAX references
# --------------------------------------------------------------------------------------
def staged_reference(x, y, edge_index, edge_weight, packed):
    """Mirror of the kernel math (same bf16 staging of Â and XΘ, same host folding)."""
    hi = jax.lax.Precision.HIGHEST
    N = x.shape[0]
    A = build_gcn_adj(edge_index, edge_weight, N).astype(jnp.bfloat16)
    t = jnp.dot(x.astype(jnp.float32), packed["w_gcn"], precision=hi).astype(jnp.bfloat16)
    p = jnp.dot(A, t, preferred_element_type=jnp.float32)
    dotf = lambda a, b: jnp.dot(a, b, precision=hi)
    z = jax.nn.sigmoid(dotf(p, packed["w_gate_z"]) + packed["b_gate_z"])
    h_tilde = jnp.tanh(dotf(p, packed["w_gate_h"]) + packed["b_gate_h"])
    h = (1.0 - z) * h_tilde
    y1 = jnp.maximum(dotf(y, packed["w_lab1"]) + packed["b_lab1"], 0.0)
    y2 = jnp.maximum(dotf(y1, packed["w_lab2"]) + packed["b_lab2"], 0.0)
    d = dotf(jnp.maximum(h, 0.0), packed["w_hd"]) + dotf(y2, packed["w_yd"]) + packed["b_d"]
    p0 = jax.nn.sigmoid(d)
    return jnp.concatenate([p0, 1.0 - p0], axis=-1)


def reference_forward(x, y, edge_index, edge_weight, p, hidden=32):
    """FULL torch math in f32 (incl. the dead r-gate and H-side terms)."""
    hi = jax.lax.Precision.HIGHEST
    N = x.shape[0]
    A = build_gcn_adj(edge_index, edge_weight, N)
    H0 = jnp.zeros((N, hidden), jnp.float32)
    conv = lambda th, b: jnp.dot(A, jnp.dot(x, th, precision=hi), precision=hi) + b
    lin = lambda w, b, v: jnp.dot(v, w.T, precision=hi) + b
    Z = jax.nn.sigmoid(lin(p["lin_z_w"], p["lin_z_b"],
                           jnp.concatenate([conv(p["theta_z"], p["gcn_bias_z"]), H0], axis=1)))
    R = jax.nn.sigmoid(lin(p["lin_r_w"], p["lin_r_b"],
                           jnp.concatenate([conv(p["theta_r"], p["gcn_bias_r"]), H0], axis=1)))
    Ht = jnp.tanh(lin(p["lin_h_w"], p["lin_h_b"],
                      jnp.concatenate([conv(p["theta_h"], p["gcn_bias_h"]), H0 * R], axis=1)))
    Hn = Z * H0 + (1.0 - Z) * Ht
    h = lin(p["lin_w"], p["lin_b"], jnp.maximum(Hn, 0.0))
    y1 = jnp.maximum(lin(p["lab1_w"], p["lab1_b"], y), 0.0)
    y2 = jnp.maximum(lin(p["lab2_w"], p["lab2_b"], y1), 0.0)
    logits = lin(p["comb_w"], p["comb_b"], jnp.concatenate([h, y2], axis=1))
    return jax.nn.softmax(logits, axis=1)


if __name__ == "__main__":
    key = jax.random.PRNGKey(0)
    k_x, k_y, k_p = jax.random.split(key, 3)

    N, Fd, C, Hd = 16, 4, 4, 32               # nodes, node_features, num_classes, hidden
    x = jax.random.normal(k_x, (N, Fd), jnp.float32)
    y_in = jax.random.normal(k_y, (N, C), jnp.float32)

    # undirected ring graph
    src = jnp.arange(N, dtype=jnp.int32)
    dst = (src + 1) % N
    edge_index = jnp.stack([jnp.concatenate([src, dst]),
                            jnp.concatenate([dst, src])], axis=0)
    edge_weight = jnp.ones((2 * N,), jnp.float32)

    params = init_params(k_p, Fd, C, hidden=Hd)
    packed = pack_params(params, hidden=Hd)

    probs, h_state = jax.jit(tgcn_attack_forward)(x, y_in, edge_index, edge_weight, packed)
    probs = jax.block_until_ready(probs)

    # sanity: shape, finiteness, rows sum to one (exact sigmoid formulation of the softmax)
    assert probs.shape == (N, 2)
    assert bool(jnp.all(jnp.isfinite(probs)))
    assert jnp.allclose(jnp.sum(probs, axis=1), 1.0, atol=1e-5)

    # tight check against a pure-JAX mirror of the kernel (same bf16 staging / folding)
    staged = staged_reference(x, y_in, edge_index, edge_weight, packed)
    assert jnp.allclose(probs, staged, atol=3e-3), float(jnp.max(jnp.abs(probs - staged)))

    # end-to-end check against the full (un-specialized, f32) torch-semantics reference
    ref = reference_forward(x, y_in, edge_index, edge_weight, params, hidden=Hd)
    assert jnp.allclose(probs, ref, atol=2e-2, rtol=2e-2), float(jnp.max(jnp.abs(probs - ref)))

    print("KERNEL_OK")
</pallas_src>

<mosaic_0001>
module attributes {stable_mosaic.version = 11 : i64} {
  func.func private @main(%arg0: i32) attributes {dimension_semantics = [#tpu.dimension_semantics<core_parallel>], iteration_bounds = array<i64: 2>, tpu.core_type = #tpu.core_type<sc_scalar_subcore>, window_params = []} {
    return
  }
}

module attributes {stable_mosaic.version = 11 : i64} {
  func.func private @main(%arg0: i32) attributes {dimension_semantics = [#tpu.dimension_semantics<core_parallel>], iteration_bounds = array<i64: 2>, tpu.core_type = #tpu.core_type<sc_scalar_subcore>, window_params = []} {
    return
  }
}

module attributes {stable_mosaic.version = 11 : i64} {
  func.func @_tgcn_attack_kernel(%arg0: i32, %arg1: memref<16x16xbf16, #tpu.memory_space<vmem>>, %arg2: memref<16x64xbf16, #tpu.memory_space<vmem>>, %arg3: memref<16x4xf32, #tpu.memory_space<vmem>>, %arg4: memref<64x32xf32, #tpu.memory_space<vmem>>, %arg5: memref<64x32xf32, #tpu.memory_space<vmem>>, %arg6: memref<1x32xf32, #tpu.memory_space<vmem>>, %arg7: memref<1x32xf32, #tpu.memory_space<vmem>>, %arg8: memref<4x32xf32, #tpu.memory_space<vmem>>, %arg9: memref<1x32xf32, #tpu.memory_space<vmem>>, %arg10: memref<32x4xf32, #tpu.memory_space<vmem>>, %arg11: memref<1x4xf32, #tpu.memory_space<vmem>>, %arg12: memref<32x1xf32, #tpu.memory_space<vmem>>, %arg13: memref<4x1xf32, #tpu.memory_space<vmem>>, %arg14: memref<1x1xf32, #tpu.memory_space<vmem>>, %arg15: memref<16x2xf32, #tpu.memory_space<vmem>>) attributes {dimension_semantics = [#tpu.dimension_semantics<parallel>], iteration_bounds = array<i64: 1>, scalar_prefetch = 0 : i64, scratch_operands = 0 : i64, tpu.core_type = #tpu.core_type<tc>, window_params = [{transform_indices = @transform_0, window_bounds = array<i64: 16, 16>}, {pipeline_mode = #tpu.pipeline_mode<synchronous>, transform_indices = @transform_1, window_bounds = array<i64: 16, 64>}, {transform_indices = @transform_2, window_bounds = array<i64: 16, 4>}, {pipeline_mode = #tpu.pipeline_mode<synchronous>, transform_indices = @transform_3, window_bounds = array<i64: 64, 32>}, {pipeline_mode = #tpu.pipeline_mode<synchronous>, transform_indices = @transform_4, window_bounds = array<i64: 64, 32>}, {pipeline_mode = #tpu.pipeline_mode<synchronous>, transform_indices = @transform_5, window_bounds = array<i64: 1, 32>}, {pipeline_mode = #tpu.pipeline_mode<synchronous>, transform_indices = @transform_6, window_bounds = array<i64: 1, 32>}, {pipeline_mode = #tpu.pipeline_mode<synchronous>, transform_indices = @transform_7, window_bounds = array<i64: 4, 32>}, {pipeline_mode = #tpu.pipeline_mode<synchronous>, transform_indices = @transform_8, window_bounds = array<i64: 1, 32>}, {pipeline_mode = #tpu.pipeline_mode<synchronous>, transform_indices = @transform_9, window_bounds = array<i64: 32, 4>}, {pipeline_mode = #tpu.pipeline_mode<synchronous>, transform_indices = @transform_10, window_bounds = array<i64: 1, 4>}, {pipeline_mode = #tpu.pipeline_mode<synchronous>, transform_indices = @transform_11, window_bounds = array<i64: 32, 1>}, {pipeline_mode = #tpu.pipeline_mode<synchronous>, transform_indices = @transform_12, window_bounds = array<i64: 4, 1>}, {pipeline_mode = #tpu.pipeline_mode<synchronous>, transform_indices = @transform_13, window_bounds = array<i64: 1, 1>}, {transform_indices = @transform_14, window_bounds = array<i64: 16, 2>}]} {
    %c0 = arith.constant 0 : index
    %c0_0 = arith.constant 0 : index
    %0 = vector.load %arg1[%c0, %c0_0] : memref<16x16xbf16, #tpu.memory_space<vmem>>, vector<16x16xbf16>
    %c0_1 = arith.constant 0 : index
    %c0_2 = arith.constant 0 : index
    %1 = vector.load %arg2[%c0_1, %c0_2] : memref<16x64xbf16, #tpu.memory_space<vmem>>, vector<16x64xbf16>
    %cst = arith.constant dense<0.000000e+00> : vector<16x64xf32>
    %2 = tpu.matmul %0, %1, %cst {dimension_numbers = #tpu.dot_dimension_numbers<[1], [0], [0], [1], [0, 0, 1, 1], [], []>} : vector<16x16xbf16>, vector<16x64xbf16>, vector<16x64xf32> -> vector<16x64xf32>
    %c0_3 = arith.constant 0 : index
    %c0_4 = arith.constant 0 : index
    %3 = vector.load %arg4[%c0_3, %c0_4] : memref<64x32xf32, #tpu.memory_space<vmem>>, vector<64x32xf32>
    %cst_5 = arith.constant dense<0.000000e+00> : vector<16x32xf32>
    %4 = tpu.matmul %2, %3, %cst_5 {dimension_numbers = #tpu.dot_dimension_numbers<[1], [0], [0], [1], [0, 0, 1, 1], [], []>} : vector<16x64xf32>, vector<64x32xf32>, vector<16x32xf32> -> vector<16x32xf32>
    %c0_6 = arith.constant 0 : index
    %c0_7 = arith.constant 0 : index
    %5 = vector.load %arg6[%c0_6, %c0_7] : memref<1x32xf32, #tpu.memory_space<vmem>>, vector<1x32xf32>
    %6 = vector.broadcast %5 : vector<1x32xf32> to vector<16x32xf32>
    %7 = arith.addf %4, %6 : vector<16x32xf32>
    %8 = arith.negf %7 : vector<16x32xf32>
    %9 = math.exp %8 : vector<16x32xf32>
    %cst_8 = arith.constant 1.000000e+00 : f32
    %10 = vector.broadcast %cst_8 : f32 to vector<16x32xf32>
    %11 = arith.addf %10, %9 : vector<16x32xf32>
    %12 = arith.divf %10, %11 : vector<16x32xf32>
    %c0_9 = arith.constant 0 : index
    %c0_10 = arith.constant 0 : index
    %13 = vector.load %arg5[%c0_9, %c0_10] : memref<64x32xf32, #tpu.memory_space<vmem>>, vector<64x32xf32>
    %cst_11 = arith.constant dense<0.000000e+00> : vector<16x32xf32>
    %14 = tpu.matmul %2, %13, %cst_11 {dimension_numbers = #tpu.dot_dimension_numbers<[1], [0], [0], [1], [0, 0, 1, 1], [], []>} : vector<16x64xf32>, vector<64x32xf32>, vector<16x32xf32> -> vector<16x32xf32>
    %c0_12 = arith.constant 0 : index
    %c0_13 = arith.constant 0 : index
    %15 = vector.load %arg7[%c0_12, %c0_13] : memref<1x32xf32, #tpu.memory_space<vmem>>, vector<1x32xf32>
    %16 = vector.broadcast %15 : vector<1x32xf32> to vector<16x32xf32>
    %17 = arith.addf %14, %16 : vector<16x32xf32>
    %18 = math.tanh %17 : vector<16x32xf32>
    %cst_14 = arith.constant 1.000000e+00 : f32
    %19 = vector.broadcast %cst_14 : f32 to vector<16x32xf32>
    %20 = arith.subf %19, %12 : vector<16x32xf32>
    %21 = arith.mulf %20, %18 : vector<16x32xf32>
    %c0_15 = arith.constant 0 : index
    %c0_16 = arith.constant 0 : index
    %22 = vector.load %arg3[%c0_15, %c0_16] : memref<16x4xf32, #tpu.memory_space<vmem>>, vector<16x4xf32>
    %c0_17 = arith.constant 0 : index
    %c0_18 = arith.constant 0 : index
    %23 = vector.load %arg8[%c0_17, %c0_18] : memref<4x32xf32, #tpu.memory_space<vmem>>, vector<4x32xf32>
    %cst_19 = arith.constant dense<0.000000e+00> : vector<16x32xf32>
    %24 = tpu.matmul %22, %23, %cst_19 {dimension_numbers = #tpu.dot_dimension_numbers<[1], [0], [0], [1], [0, 0, 1, 1], [], []>} : vector<16x4xf32>, vector<4x32xf32>, vector<16x32xf32> -> vector<16x32xf32>
    %c0_20 = arith.constant 0 : index
    %c0_21 = arith.constant 0 : index
    %25 = vector.load %arg9[%c0_20, %c0_21] : memref<1x32xf32, #tpu.memory_space<vmem>>, vector<1x32xf32>
    %26 = vector.broadcast %25 : vector<1x32xf32> to vector<16x32xf32>
    %27 = arith.addf %24, %26 : vector<16x32xf32>
    %cst_22 = arith.constant 0.000000e+00 : f32
    %28 = vector.broadcast %cst_22 : f32 to vector<16x32xf32>
    %29 = arith.maximumf %27, %28 : vector<16x32xf32>
    %c0_23 = arith.constant 0 : index
    %c0_24 = arith.constant 0 : index
    %30 = vector.load %arg10[%c0_23, %c0_24] : memref<32x4xf32, #tpu.memory_space<vmem>>, vector<32x4xf32>
    %cst_25 = arith.constant dense<0.000000e+00> : vector<16x4xf32>
    %31 = tpu.matmul %29, %30, %cst_25 {dimension_numbers = #tpu.dot_dimension_numbers<[1], [0], [0], [1], [0, 0, 1, 1], [], []>} : vector<16x32xf32>, vector<32x4xf32>, vector<16x4xf32> -> vector<16x4xf32>
    %c0_26 = arith.constant 0 : index
    %c0_27 = arith.constant 0 : index
    %32 = vector.load %arg11[%c0_26, %c0_27] : memref<1x4xf32, #tpu.memory_space<vmem>>, vector<1x4xf32>
    %33 = vector.broadcast %32 : vector<1x4xf32> to vector<16x4xf32>
    %34 = arith.addf %31, %33 : vector<16x4xf32>
    %cst_28 = arith.constant 0.000000e+00 : f32
    %35 = vector.broadcast %cst_28 : f32 to vector<16x4xf32>
    %36 = arith.maximumf %34, %35 : vector<16x4xf32>
    %cst_29 = arith.constant 0.000000e+00 : f32
    %37 = vector.broadcast %cst_29 : f32 to vector<16x32xf32>
    %38 = arith.maximumf %21, %37 : vector<16x32xf32>
    %c0_30 = arith.constant 0 : index
    %c0_31 = arith.constant 0 : index
    %39 = vector.load %arg12[%c0_30, %c0_31] : memref<32x1xf32, #tpu.memory_space<vmem>>, vector<32x1xf32>
    %cst_32 = arith.constant dense<0.000000e+00> : vector<16x1xf32>
    %40 = tpu.matmul %38, %39, %cst_32 {dimension_numbers = #tpu.dot_dimension_numbers<[1], [0], [0], [1], [0, 0, 1, 1], [], []>} : vector<16x32xf32>, vector<32x1xf32>, vector<16x1xf32> -> vector<16x1xf32>
    %c0_33 = arith.constant 0 : index
    %c0_34 = arith.constant 0 : index
    %41 = vector.load %arg13[%c0_33, %c0_34] : memref<4x1xf32, #tpu.memory_space<vmem>>, vector<4x1xf32>
    %cst_35 = arith.constant dense<0.000000e+00> : vector<16x1xf32>
    %42 = tpu.matmul %36, %41, %cst_35 {dimension_numbers = #tpu.dot_dimension_numbers<[1], [0], [0], [1], [0, 0, 1, 1], [], []>} : vector<16x4xf32>, vector<4x1xf32>, vector<16x1xf32> -> vector<16x1xf32>
    %43 = arith.addf %40, %42 : vector<16x1xf32>
    %c0_36 = arith.constant 0 : index
    %c0_37 = arith.constant 0 : index
    %44 = vector.load %arg14[%c0_36, %c0_37] : memref<1x1xf32, #tpu.memory_space<vmem>>, vector<1x1xf32>
    %45 = vector.broadcast %44 : vector<1x1xf32> to vector<16x1xf32>
    %46 = arith.addf %43, %45 : vector<16x1xf32>
    %47 = arith.negf %46 : vector<16x1xf32>
    %48 = math.exp %47 : vector<16x1xf32>
    %cst_38 = arith.constant 1.000000e+00 : f32
    %49 = vector.broadcast %cst_38 : f32 to vector<16x1xf32>
    %50 = arith.addf %49, %48 : vector<16x1xf32>
    %51 = arith.divf %49, %50 : vector<16x1xf32>
    %cst_39 = arith.constant 1.000000e+00 : f32
    %52 = vector.broadcast %cst_39 : f32 to vector<16x1xf32>
    %53 = arith.subf %52, %51 : vector<16x1xf32>
    %54 = tpu.concatenate %51, %53 in 1 : vector<16x1xf32>, vector<16x1xf32> -> vector<16x2xf32>
    %c0_40 = arith.constant 0 : index
    %c0_41 = arith.constant 0 : index
    %55 = vector.load %arg15[%c0_40, %c0_41] : memref<16x2xf32, #tpu.memory_space<vmem>>, vector<16x2xf32>
    tpu.vector_store %arg15[%c0_40, %c0_41], %54 {strides = array<i32>} : memref<16x2xf32, #tpu.memory_space<vmem>>, vector<16x2xf32>,
    return
  }
  func.func @transform_0(%arg0: i32) -> (i32, i32) {
    %c0_i32 = arith.constant 0 : i32
    %c0_i32_0 = arith.constant 0 : i32
    return %arg0, %c0_i32 : i32, i32
  }
  func.func @transform_1(%arg0: i32) -> (i32, i32) {
    %c0_i32 = arith.constant 0 : i32
    %c0_i32_0 = arith.constant 0 : i32
    %c0_i32_1 = arith.constant 0 : i32
    return %c0_i32, %c0_i32_0 : i32, i32
  }
  func.func @transform_2(%arg0: i32) -> (i32, i32) {
    %c0_i32 = arith.constant 0 : i32
    %c0_i32_0 = arith.constant 0 : i32
    return %arg0, %c0_i32 : i32, i32
  }
  func.func @transform_3(%arg0: i32) -> (i32, i32) {
    %c0_i32 = arith.constant 0 : i32
    %c0_i32_0 = arith.constant 0 : i32
    %c0_i32_1 = arith.constant 0 : i32
    return %c0_i32, %c0_i32_0 : i32, i32
  }
  func.func @transform_4(%arg0: i32) -> (i32, i32) {
    %c0_i32 = arith.constant 0 : i32
    %c0_i32_0 = arith.constant 0 : i32
    %c0_i32_1 = arith.constant 0 : i32
    return %c0_i32, %c0_i32_0 : i32, i32
  }
  func.func @transform_5(%arg0: i32) -> (i32, i32) {
    %c0_i32 = arith.constant 0 : i32
    %c0_i32_0 = arith.constant 0 : i32
    %c0_i32_1 = arith.constant 0 : i32
    return %c0_i32, %c0_i32_0 : i32, i32
  }
  func.func @transform_6(%arg0: i32) -> (i32, i32) {
    %c0_i32 = arith.constant 0 : i32
    %c0_i32_0 = arith.constant 0 : i32
    %c0_i32_1 = arith.constant 0 : i32
    return %c0_i32, %c0_i32_0 : i32, i32
  }
  func.func @transform_7(%arg0: i32) -> (i32, i32) {
    %c0_i32 = arith.constant 0 : i32
    %c0_i32_0 = arith.constant 0 : i32
    %c0_i32_1 = arith.constant 0 : i32
    return %c0_i32, %c0_i32_0 : i32, i32
  }
  func.func @transform_8(%arg0: i32) -> (i32, i32) {
    %c0_i32 = arith.constant 0 : i32
    %c0_i32_0 = arith.constant 0 : i32
    %c0_i32_1 = arith.constant 0 : i32
    return %c0_i32, %c0_i32_0 : i32, i32
  }
  func.func @transform_9(%arg0: i32) -> (i32, i32) {
    %c0_i32 = arith.constant 0 : i32
    %c0_i32_0 = arith.constant 0 : i32
    %c0_i32_1 = arith.constant 0 : i32
    return %c0_i32, %c0_i32_0 : i32, i32
  }
  func.func @transform_10(%arg0: i32) -> (i32, i32) {
    %c0_i32 = arith.constant 0 : i32
    %c0_i32_0 = arith.constant 0 : i32
    %c0_i32_1 = arith.constant 0 : i32
    return %c0_i32, %c0_i32_0 : i32, i32
  }
  func.func @transform_11(%arg0: i32) -> (i32, i32) {
    %c0_i32 = arith.constant 0 : i32
    %c0_i32_0 = arith.constant 0 : i32
    %c0_i32_1 = arith.constant 0 : i32
    return %c0_i32, %c0_i32_0 : i32, i32
  }
  func.func @transform_12(%arg0: i32) -> (i32, i32) {
    %c0_i32 = arith.constant 0 : i32
    %c0_i32_0 = arith.constant 0 : i32
    %c0_i32_1 = arith.constant 0 : i32
    return %c0_i32, %c0_i32_0 : i32, i32
  }
  func.func @transform_13(%arg0: i32) -> (i32, i32) {
    %c0_i32 = arith.constant 0 : i32
    %c0_i32_0 = arith.constant 0 : i32
    %c0_i32_1 = arith.constant 0 : i32
    return %c0_i32, %c0_i32_0 : i32, i32
  }
  func.func @transform_14(%arg0: i32) -> (i32, i32) {
    %c0_i32 = arith.constant 0 : i32
    %c0_i32_0 = arith.constant 0 : i32
    return %arg0, %c0_i32 : i32, i32
  }
}

</mosaic_0001>

<bundles_post_ra>
// kernel: tgcn_attack_forward.1
= control target key start
LH: loop header
LB: loop body
LE: loop exit
PB: predicated region body
PF: predicated region fallthrough
CT: control target
= control target key end

     0   :  { %v938_v0 = vmov 0.0   ;;  %vm939_vm0 = vmmov 0   ;;  %vm65_vm1 = vcmask 130048   ;;  %vm332_vm2 = vcmask 1043456   ;;  %s1139_s1 = inlined_call_operand.vmem [shape: bf16[16,64], index: 1, kind: input, shape index: {}]   ;;  %s1140_s0 = inlined_call_operand.vmem [shape: bf16[16,16], index: 0, kind: input, shape index: {}]   ;;  %s1141_s3 = inlined_call_operand.vmem [shape: f32[64,32], index: 3, kind: input, shape index: {}]   ;;  %s1142_s4 = inlined_call_operand.vmem [shape: f32[64,32], index: 4, kind: input, shape index: {}]   ;;  %s1143_s7 = inlined_call_operand.vmem [shape: f32[4,32], index: 7, kind: input, shape index: {}]   ;;  %s1144_s2 = inlined_call_operand.vmem [shape: f32[16,4], index: 2, kind: input, shape index: {}]   ;;  %s1145_s9 = inlined_call_operand.vmem [shape: f32[32,4], index: 9, kind: input, shape index: {}]   ;;  %s1146_s5 = inlined_call_operand.vmem [shape: f32[1,32], index: 5, kind: input, shape index: {}]   ;;  %s1147_s8 = inlined_call_operand.vmem [shape: f32[1,32], index: 8, kind: input, shape index: {}]   ;;  %s1148_s6 = inlined_call_operand.vmem [shape: f32[1,32], index: 6, kind: input, shape index: {}]   ;;  %s1149_s12 = inlined_call_operand.vmem [shape: f32[4,1], index: 12, kind: input, shape index: {}]   ;;  %s1150_s11 = inlined_call_operand.vmem [shape: f32[32,1], index: 11, kind: input, shape index: {}]   ;;  %s1151_s13 = inlined_call_operand.<no memory space> [shape: f32[1,1], index: 13, kind: input, shape index: {}]   ;;  %s1152_s10 = inlined_call_operand.vmem [shape: f32[1,4], index: 10, kind: input, shape index: {}]   ;;  %s1153_s14 = inlined_call_operand.vmem [shape: f32[16,2], index: 14, kind: output, shape index: {}]  }
   0x1   :  { %787 = vmatprep.subr.bf16.mxu0 %v938_v0  ;;  %v916_v1 = vld [vmem:[%s1139_s1] sm:$0xff]   ;;  %789 = vmatprep.mubr.msk.bf16.mxu0 %vm939_vm0, %v938_v0  ;;  %v111_v4 = vld [vmem:[%s1141_s3 + $0x8] sm:$0xff]  ;;  %v112_v8 = vld [vmem:[%s1141_s3 + $0x10] sm:$0xff]  ;;  %vm125_vm3 = vcmask 523264   ;;  %vm325_vm4 = vcmask 31744   ;;  %vm424_vm5 = vcmask 261120  }
   0x2   :  { %v917_v2 = vld [vmem:[%s1140_s0] sm:$0xff]   ;;  %788 = vmatpush3.bf16.msra.mxu0 %v916_v1  ;;  %v220_v7 = vld [vmem:[%s1142_s4 + $0x8] sm:$0xff]  ;;  %v113_v9 = vld [vmem:[%s1141_s3 + $0x18] sm:$0xff]  ;;  %vm711_vm6 = vcmask 7168   ;;  %vm714_vm7 = vcmask 15360  }
   0x3   :  { %v110_v3 = vld [vmem:[%s1141_s3] sm:$0xff]  ;;  %v867_v11 = vpack.c.bf16 %v113_v9, %v112_v8  ;;  %v221_v12 = vld [vmem:[%s1142_s4 + $0x10] sm:$0xff]  ;;  %v222_v13 = vld [vmem:[%s1142_s4 + $0x18] sm:$0xff] }
   0x4   :  { %v219_v5 = vld [vmem:[%s1142_s4] sm:$0xff]  ;;  %v863_v6 = vpack.c.bf16 %v111_v4, %v110_v3  ;;  %v883_v15 = vpack.c.bf16 %v222_v13, %v221_v12  ;;  %v115_v16 = vld [vmem:[%s1141_s3 + $0x28] sm:$0xff]  ;;  %v116_v21 = vld [vmem:[%s1141_s3 + $0x30] sm:$0xff] }
   0x5   :  { %v879_v10 = vpack.c.bf16 %v220_v7, %v219_v5  ;;  %v114_v14 = vld [vmem:[%s1141_s3 + $0x20] sm:$0xff]  ;;  %790 = vmatmul.mubr.msk.bf16.vlgmr.msra.gmra.mrb[0].mxu0 %vm65_vm1, %v917_v2  ;;  %v224_v18 = vld [vmem:[%s1142_s4 + $0x28] sm:$0xff]  ;;  %v117_v22 = vld [vmem:[%s1141_s3 + $0x38] sm:$0xff] }
   0x6   :  { %864 = vmatprep.subr.bf16.mxu1 %v863_v6  ;;  %v223_v17 = vld [vmem:[%s1142_s4 + $0x20] sm:$0xff]  ;;  %v871_v19 = vpack.c.bf16 %v115_v16, %v114_v14  ;;  %v225_v23 = vld [vmem:[%s1142_s4 + $0x30] sm:$0xff]  ;;  %v226_v24 = vld [vmem:[%s1142_s4 + $0x38] sm:$0xff]  ;;  %v875_v25 = vpack.c.bf16 %v117_v22, %v116_v21 }
   0x7   :  { %866 = vmatpush3.bf16.msra.mxu1 %v863_v6  ;;  %880 = vmatprep.subr.bf16.mxu0 %v879_v10  ;;  %v887_v20 = vpack.c.bf16 %v224_v18, %v223_v17  ;;  %v891_v26 = vpack.c.bf16 %v226_v24, %v225_v23  ;;  %v317_v27 = vld [vmem:[%s1143_s7] sm:$0xf]  ;;  %v316_v33 = vld [vmem:[%s1144_s2 + $0x8] sm:$0xff]  ;;  %v415_v37 = vld [vmem:[%s1145_s9 + $0x10] sm:$0xff] }
   0x8   :  { %882 = vmatpush3.bf16.msra.mxu0 %v879_v10  ;;  %868 = vmatprep.subr.bf16.mxu1 %v867_v11  ;;  %v315_v30 = vld [vmem:[%s1144_s2] sm:$0xff]  ;;  %v414_v35 = vld [vmem:[%s1145_s9 + $0x8] sm:$0xff]  ;;  %v416_v38 = vld [vmem:[%s1145_s9 + $0x18] sm:$0xff] }
   0x9   :  { %884 = vmatprep.subr.bf16.mxu0 %v883_v15  ;;  %v413_v34 = vld [vmem:[%s1145_s9] sm:$0xff]  ;;  %v899_v39 = vpack.c.bf16 %v416_v38, %v415_v37  ;;  %v511_v9 = vld [vmem:[%s1150_s11 + $0x8] sm:$0xff]  ;;  %v512_v17 = vld [vmem:[%s1150_s11 + $0x10] sm:$0xff] }
   0xa   :  { %v895_v36 = vpack.c.bf16 %v414_v35, %v413_v34  ;;  %v724_v40 = vld [vmem:[%s1146_s5] ss:$0 sm:$0xff]  ;;  %v513_v18 = vld [vmem:[%s1150_s11 + $0x18] sm:$0xff] }
   0xb   :  { %870 = vmatpush3.bf16.msra.mxu1 %v867_v11  ;;  %v732_v47 = vld [vmem:[%s1147_s8] ss:$0 sm:$0xff]  ;;  %v19_v11 = vstv %s1151_s13  ;;  %v907_v21 = vpack.c.bf16 %v513_v18, %v512_v17 }
   0xc   :  { %886 = vmatpush3.bf16.msra.mxu0 %v883_v15  ;;  %872 = vmatprep.subr.bf16.mxu1 %v871_v19  ;;  %v729_v56 = vld [vmem:[%s1148_s6] ss:$0 sm:$0xff]  ;;  %20 = vst [vmem:[#allocation2] sm:$0x1] %v19_v11 }
   0xd   :  { %888 = vmatprep.subr.bf16.mxu0 %v887_v20  ;;  %v514_v7 = vld [vmem:[%s1149_s12] sm:$0xf] }
   0xe   :  { %v510_v8 = vld [vmem:[%s1150_s11] sm:$0xff] }
   0xf   :  { %874 = vmatpush3.bf16.msra.mxu1 %v871_v19  ;;  %v903_v10 = vpack.c.bf16 %v511_v9, %v510_v8  ;;  %v736_v12 = vld [vmem:[%s1152_s10] ss:$0 sm:$0xff]  ;;  %s940_s10 = smov 1  }
  0x10   :  { %890 = vmatpush3.bf16.msra.mxu0 %v887_v20  ;;  %876 = vmatprep.subr.bf16.mxu1 %v875_v25 }
  0x11   :  { %892 = vmatprep.subr.bf16.mxu0 %v891_v26 }
  0x13   :  { %878 = vmatpush3.bf16.msra.mxu1 %v875_v25  ;;  %v744_v24 = vld [vmem:[#allocation2] ss:$0 sm:$0xff] }
  0x14   :  { %894 = vmatpush3.bf16.msra.mxu0 %v891_v26  ;;  %831 = vmatprep.subr.msk.mxu1 %vm332_vm2, %v317_v27 }
  0x15   :  { %896 = vmatprep.subr.bf16.mxu0 %v895_v36 }
  0xd8   :  { %v103_v28 = vpop.f32.mrb[0].mxu0 }
  0xd9   :  { %v791_v29 = vpop.f32.mrb[1].mxu0  ;;  %809 = vmatprep.mubr.msk.f32.mxu1 %vm125_vm3, %v103_v28  ;;  %828 = vmatprep.mubr.msk.f32.mxu0 %vm125_vm3, %v103_v28 }
  0xda   :  { %v106_v31 = vpop.f32.mrb[2].mxu0 }
  0xdb   :  { %v792_v32 = vpop.f32.mrb[3].mxu0  ;;  %810 = vmatmul.mubr.msk.f32.vlgmr.msra.gmra.mrb[0].mxu1 %vm125_vm3, %v106_v31  ;;  %829 = vmatmul.mubr.msk.f32.vlgmr.msra.gmra.mrb[4].mxu0 %vm125_vm3, %v106_v31 }
  0xdc   :  { %832 = vmatpush3.msk.msra.mxu1 %vm332_vm2, %v317_v27  ;;  %833 = vmatprep.mubr.msk.f32.mxu1 %vm325_vm4, %v315_v30 }
  0xdd   :  { %898 = vmatpush3.bf16.msra.mxu0 %v895_v36  ;;  %847 = vmatprep.subr.msk.mxu1 %vm332_vm2, %v514_v7 }
  0xde   :  { %900 = vmatprep.subr.bf16.mxu0 %v899_v39 }
  0xdf   :  { %834 = vmatmul.mubr.msk.f32.vlgmr.msra.gmra.mrb[2].mxu1 %vm325_vm4, %v316_v33 }
  0xe0   :  { %848 = vmatpush3.msk.msra.mxu1 %vm332_vm2, %v514_v7 }
  0xe1   :  { %902 = vmatpush3.bf16.msra.mxu0 %v899_v39  ;;  %904 = vmatprep.subr.bf16.mxu1 %v903_v10 }
 0x1ae   :  { %v811_v41 = vpop.f32.mrb[0].mxu1  ;;  %v830_v42 = vpop.f32.mrb[4].mxu0 }
 0x1af   :  { %v204_v43 = vadd.f32 %v811_v41, %v724_v40  ;;  %v198_v44 = vpop.f32.mrb[1].mxu1  ;;  %v300_v45 = vpop.f32.mrb[5].mxu0  ;;  %v306_v60 = vadd.f32 %v830_v42, %v729_v56 }
 0x1b0   :  { %v199_v46 = vadd.f32 %v724_v40, %v198_v44  ;;  %v301_v62 = vadd.f32 %v729_v56, %v300_v45 }
 0x1b1   :  { %v728_v48 = vmul.f32 -1.442695, %v204_v43 }
 0x1b2   :  { %v727_v49 = vmul.f32 -1.442695, %v199_v46  ;;  %v835_v50 = vpop.f32.mrb[2].mxu1 }
 0x1b3   :  { %918 = vpow2.f32 %v728_v48  ;;  %v408_v51 = vadd.f32 %v835_v50, %v732_v47  ;;  %v402_v52 = vpop.f32.mrb[3].mxu1 }
 0x1b4   :  { %920 = vpow2.f32 %v727_v49  ;;  %v403_v53 = vadd.f32 %v732_v47, %v402_v52 }
 0x1b5   :  { %v412_v55 = vmax.f32 %v408_v51, 0.0 }
 0x1b6   :  { %v411_v54 = vmax.f32 %v403_v53, 0.0 }
 0x1b8   :  { %844 = vmatprep.mubr.msk.f32.mxu0 %vm424_vm5, %v411_v54 }
 0x1b9   :  { %845 = vmatmul.mubr.msk.f32.vlgmr.msra.gmra.mrb[6].mxu0 %vm424_vm5, %v412_v55 }
 0x1bd   :  { %v919_v57 = vpop.eup %918 }
 0x1be   :  { %v921_v58 = vpop.eup %920  ;;  %v214_v59 = vadd.f32 1.0, %v919_v57 }
 0x1bf   :  { %v213_v61 = vadd.f32 1.0, %v921_v58 }
 0x1c0   :  { %922 = vrcp.f32 %v214_v59 }
 0x1c1   :  { %924 = vrcp.f32 %v213_v61 }
 0x1c2   :  { %926 = vtanh.f32 %v306_v60 }
 0x1c3   :  { %928 = vtanh.f32 %v301_v62 }
 0x1ca   :  { %v923_v63 = vpop.eup %922 }
 0x1cb   :  { %v925_v0 = vpop.eup %924  ;;  %v312_v1 = vsub.f32 1.0, %v923_v63 }
 0x1cc   :  { %v927_v2 = vpop.eup %926  ;;  %v311_v3 = vsub.f32 1.0, %v925_v0 }
 0x1cd   :  { %v929_v4 = vpop.eup %928  ;;  %v314_v5 = vmul.f32 %v927_v2, %v312_v1 }
 0x1ce   :  { %v313_v6 = vmul.f32 %v929_v4, %v311_v3 }
 0x1cf   :  { %v509_v23 = vmax.f32 %v314_v5, 0.0 }
 0x1d0   :  { %v508_v22 = vmax.f32 %v313_v6, 0.0 }
 0x28c   :  { %v846_v13 = vpop.f32.mrb[6].mxu0 }
 0x28d   :  { %v503_v14 = vadd.f32 %v846_v13, %v736_v12  ;;  %v497_v15 = vpop.f32.mrb[7].mxu0 }
 0x28e   :  { %v498_v16 = vadd.f32 %v736_v12, %v497_v15 }
 0x28f   :  { %v507_v20 = vmax.f32 %v503_v14, 0.0 }
 0x290   :  { %v506_v19 = vmax.f32 %v498_v16, 0.0 }
 0x292   :  { %849 = vmatprep.mubr.msk.f32.mxu1 %vm325_vm4, %v506_v19 }
 0x293   :  { %850 = vmatmul.mubr.msk.f32.vlgmr.msra.gmra.mrb[4].mxu1 %vm325_vm4, %v507_v20 }
 0x294   :  { %906 = vmatpush3.bf16.msra.mxu1 %v903_v10  ;;  %860 = vmatprep.mubr.msk.f32.mxu1 %vm424_vm5, %v508_v22 }
 0x295   :  { %908 = vmatprep.subr.bf16.mxu1 %v907_v21 }
 0x298   :  { %910 = vmatpush3.bf16.msra.mxu1 %v907_v21 }
 0x29b   :  { %861 = vmatmul.mubr.msk.f32.vlgmr.msra.gmra.mrb[4].mxu1 %vm424_vm5, %v509_v23 }
 0x36e   :  { %v862_v25 = vpop.f32.mrb[4].mxu1 }
 0x36f   :  { %v688_v26 = vadd.f32 %v862_v25, %v744_v24  ;;  %v671_v27 = vpop.f32.mrb[5].mxu1 }
 0x370   :  { %v687_v28 = vadd.f32 %v744_v24, %v671_v27 }
 0x371   :  { %v746_v29 = vmul.f32 -1.442695, %v688_v26 }
 0x372   :  { %v745_v30 = vmul.f32 -1.442695, %v687_v28 }
 0x373   :  { %930 = vpow2.f32 %v746_v29 }
 0x374   :  { %932 = vpow2.f32 %v745_v30 }
 0x37d   :  { %v931_v31 = vpop.eup %930 }
 0x37e   :  { %v933_v32 = vpop.eup %932  ;;  %v696_v33 = vadd.f32 1.0, %v931_v31 }
 0x37f   :  { %v695_v34 = vadd.f32 1.0, %v933_v32 }
 0x381   :  { %934 = vrcp.f32 %v695_v34 }
 0x382   :  { %936 = vrcp.f32 %v696_v33 }
 0x38b   :  { %v935_v35 = vpop.eup %934 }
 0x38c   :  { %v701_v36 = vsub.f32 1.0, %v935_v35  ;;  %v937_v37 = vpop.eup %936 }
 0x38d   :  { %v702_v38 = vsub.f32 1.0, %v937_v37 }
 0x38e   :  { %705 = vrot.lane.b32.xlu0 %v701_v36, %s940_s10 }
 0x392   :  { %707 = vrot.lane.b32.xlu0 %v702_v38, %s940_s10 }
 0x400   :  { %v706_v39 = vpop.permute.xlu0 %705 }
 0x401   :  { %v712_v40 = vsel %vm711_vm6, %v935_v35, %v706_v39 }
 0x402   :  { %715 = vst.msk [vmem:[%s1153_s14] sm:$0xff] %vm714_vm7, %v712_v40 }
 0x404   :  { %v708_v41 = vpop.permute.xlu0 %707 }
 0x405   :  { %v713_v42 = vsel %vm711_vm6, %v937_v37, %v708_v41 }
 0x406   :  { %716 = vst.msk [vmem:[%s1153_s14 + $0x8] sm:$0xff] %vm714_vm7, %v713_v42 }

</bundles_post_ra>
